<compile_context>
chip_gen: v6e
topology: v6e:2x2x1
jax: 0.10.0
libtpu: 0.0.40
codegen_flags: <defaults>
</compile_context>

<pallas_src>
import math

import jax
import jax.numpy as jnp
from jax.experimental import pallas as pl
from jax.experimental.pallas import tpu as pltpu

IN_DIM, H1, H2, OUT_DIM = 7, 49, 196, 28 * 28
_SPLIT = 384  # lane-aligned split of the 784-wide layer-3 output (384 + 400)


def _round_up(x, m):
    return (x + m - 1) // m * m


def decoder_kernel(z_ref, w1_ref, b1_ref, w2_ref, b2_ref, w3_ref, b3_ref,
                   out_ref):
    """Fused 3-layer MLP decoder for one TM-row batch tile.

    Matmuls run in bf16 on the MXU with f32 accumulation; bias / ReLU / tanh
    epilogues stay in f32.  Layer 3 is split into two lane-aligned column
    chunks so the EUP/VPU epilogue of chunk j overlaps the MXU work of j+1.
    """
    z = z_ref[...].astype(jnp.bfloat16)                              # (TM, 7)

    # ---- f1 + ReLU ----------------------------------------------------
    h1 = jnp.dot(z, w1_ref[...], preferred_element_type=jnp.float32)
    h1 = jnp.maximum(h1 + b1_ref[...], 0.0).astype(jnp.bfloat16)     # (TM, 49)

    # ---- f2 + ReLU ----------------------------------------------------
    h2 = jnp.dot(h1, w2_ref[...], preferred_element_type=jnp.float32)
    h2 = jnp.maximum(h2 + b2_ref[...], 0.0).astype(jnp.bfloat16)     # (TM, 196)

    # ---- f3 + tanh (chunked along the 784 output columns) --------------
    for lo, hi in ((0, _SPLIT), (_SPLIT, OUT_DIM)):
        h3 = jnp.dot(h2, w3_ref[:, lo:hi],
                     preferred_element_type=jnp.float32)             # (TM, chunk)
        out_ref[:, lo:hi] = jnp.tanh(h3 + b3_ref[:, lo:hi]).astype(out_ref.dtype)


def _batch_dim_semantics():
    """CORE_PARALLEL on multi-TensorCore v7x; plain PARALLEL elsewhere."""
    try:
        kind = jax.devices()[0].device_kind.lower()
    except Exception:  # pragma: no cover - defensive
        kind = ""
    if "v7" in kind and hasattr(pltpu, "CORE_PARALLEL"):
        return (pltpu.CORE_PARALLEL,)
    return (pltpu.PARALLEL,)


def decoder_forward(z, params, *, tm=1024, out_dtype=jnp.float32):
    """Run the batch-tiled fused decoder Pallas kernel.

    z        : (B, 7) float32
    params   : dict with w1(7,49), b1(1,49), w2(49,196), b2(1,196),
               w3(196,784), b3(1,784)  (weights already (in, out))
    tm       : target batch-tile rows (multiple of 8; clamped for small B)
    out_dtype: output dtype (float32 default; bfloat16 halves writeback bytes)
    returns  : (B, 784) out_dtype
    """
    B = z.shape[0]

    # MXU operands in bf16 (f32 accumulate inside the kernel); biases stay f32.
    w1 = params["w1"].astype(jnp.bfloat16)
    w2 = params["w2"].astype(jnp.bfloat16)
    w3 = params["w3"].astype(jnp.bfloat16)
    b1, b2, b3 = params["b1"], params["b2"], params["b3"]

    # Batch tile: multiple of 8, no larger than the (8-rounded) batch.
    tm = max(8, min(_round_up(tm, 8), _round_up(B, 8)))
    b_pad = _round_up(B, tm)
    if b_pad != B:
        z = jnp.pad(z, ((0, b_pad - B), (0, 0)))
    grid = (b_pad // tm,)

    # Weights/biases: full-array blocks with a constant index_map -> DMA'd
    # into VMEM once and resident across all grid steps.
    def const_spec(shape):
        return pl.BlockSpec(shape, lambda i: (0,) * len(shape))

    flops = 2 * b_pad * (IN_DIM * H1 + H1 * H2 + H2 * OUT_DIM)
    weight_bytes = (2 * (IN_DIM * H1 + H1 * H2 + H2 * OUT_DIM)     # bf16 weights
                    + 4 * (H1 + H2 + OUT_DIM))                     # f32 biases
    bytes_accessed = (weight_bytes
                      + 4 * b_pad * IN_DIM
                      + jnp.dtype(out_dtype).itemsize * b_pad * OUT_DIM)

    out = pl.pallas_call(
        decoder_kernel,
        out_shape=jax.ShapeDtypeStruct((b_pad, OUT_DIM), out_dtype),
        grid=grid,
        in_specs=[
            pl.BlockSpec((tm, IN_DIM), lambda i: (i, 0)),
            const_spec(w1.shape), const_spec(b1.shape),
            const_spec(w2.shape), const_spec(b2.shape),
            const_spec(w3.shape), const_spec(b3.shape),
        ],
        out_specs=pl.BlockSpec((tm, OUT_DIM), lambda i: (i, 0)),
        compiler_params=pltpu.CompilerParams(
            dimension_semantics=_batch_dim_semantics(),
            vmem_limit_bytes=40 * 1024 * 1024),
        cost_estimate=pl.CostEstimate(
            flops=flops,
            transcendentals=b_pad * OUT_DIM,
            bytes_accessed=int(bytes_accessed)),
    )(z, w1, b1, w2, b2, w3, b3)

    return out[:B] if b_pad != B else out


def init_params(key):
    """Deterministic PyTorch-style (kaiming-uniform-ish) initialization (f32)."""
    dims = [(IN_DIM, H1), (H1, H2), (H2, OUT_DIM)]
    params = {}
    for i, (fan_in, fan_out) in enumerate(dims, start=1):
        key, kw, kb = jax.random.split(key, 3)
        bound = 1.0 / math.sqrt(fan_in)
        # PyTorch stores W as (out, in); transpose to (in, out) for x @ W.
        w_pt = jax.random.uniform(kw, (fan_out, fan_in), jnp.float32,
                                  -bound, bound)
        b_pt = jax.random.uniform(kb, (fan_out,), jnp.float32, -bound, bound)
        params[f"w{i}"] = w_pt.T                    # (in, out)
        params[f"b{i}"] = b_pt.reshape(1, fan_out)  # broadcast over batch
    return params


def decoder_reference(z, params):
    """Pure-JAX f32 reference of the PyTorch forward, for validation."""
    h = jax.nn.relu(z @ params["w1"] + params["b1"])
    h = jax.nn.relu(h @ params["w2"] + params["b2"])
    return jnp.tanh(h @ params["w3"] + params["b3"])


if __name__ == "__main__":
    key = jax.random.PRNGKey(0)
    key, kz1, kz2 = jax.random.split(key, 3)
    params = init_params(key)

    # bf16 MXU operands vs f32 reference -> loosened tolerance.
    ATOL, RTOL = 2e-2, 2e-2

    # Small batch: single grid step (TM clamped to 8).
    B = 8
    z = jax.random.normal(kz1, (B, IN_DIM), jnp.float32)
    out = jax.block_until_ready(decoder_forward(z, params))
    ref = decoder_reference(z, params)
    assert out.shape == (B, OUT_DIM), out.shape
    assert jnp.allclose(out, ref, atol=ATOL, rtol=RTOL), (
        float(jnp.max(jnp.abs(out - ref))))

    # Non-multiple batch with a tiny tile: exercises the batch grid + padding.
    B2 = 20
    z2 = jax.random.normal(kz2, (B2, IN_DIM), jnp.float32)
    out2 = jax.block_until_ready(decoder_forward(z2, params, tm=8))
    ref2 = decoder_reference(z2, params)
    assert out2.shape == (B2, OUT_DIM), out2.shape
    assert jnp.allclose(out2, ref2, atol=ATOL, rtol=RTOL), (
        float(jnp.max(jnp.abs(out2 - ref2))))

    print("KERNEL_OK")
</pallas_src>

<mosaic_0001>
module attributes {stable_mosaic.version = 11 : i64} {
  func.func @decoder_kernel(%arg0: i32, %arg1: memref<8x7xf32, #tpu.memory_space<vmem>>, %arg2: memref<7x49xbf16, #tpu.memory_space<vmem>>, %arg3: memref<1x49xf32, #tpu.memory_space<vmem>>, %arg4: memref<49x196xbf16, #tpu.memory_space<vmem>>, %arg5: memref<1x196xf32, #tpu.memory_space<vmem>>, %arg6: memref<196x784xbf16, #tpu.memory_space<vmem>>, %arg7: memref<1x784xf32, #tpu.memory_space<vmem>>, %arg8: memref<8x784xf32, #tpu.memory_space<vmem>>) attributes {dimension_semantics = [#tpu.dimension_semantics<parallel>], iteration_bounds = array<i64: 1>, scalar_prefetch = 0 : i64, scratch_operands = 0 : i64, tpu.core_type = #tpu.core_type<tc>, window_params = [{transform_indices = @transform_0, window_bounds = array<i64: 8, 7>}, {pipeline_mode = #tpu.pipeline_mode<synchronous>, transform_indices = @transform_1, window_bounds = array<i64: 7, 49>}, {pipeline_mode = #tpu.pipeline_mode<synchronous>, transform_indices = @transform_2, window_bounds = array<i64: 1, 49>}, {pipeline_mode = #tpu.pipeline_mode<synchronous>, transform_indices = @transform_3, window_bounds = array<i64: 49, 196>}, {pipeline_mode = #tpu.pipeline_mode<synchronous>, transform_indices = @transform_4, window_bounds = array<i64: 1, 196>}, {pipeline_mode = #tpu.pipeline_mode<synchronous>, transform_indices = @transform_5, window_bounds = array<i64: 196, 784>}, {pipeline_mode = #tpu.pipeline_mode<synchronous>, transform_indices = @transform_6, window_bounds = array<i64: 1, 784>}, {transform_indices = @transform_7, window_bounds = array<i64: 8, 784>}]} {
    %c0 = arith.constant 0 : index
    %c0_0 = arith.constant 0 : index
    %0 = vector.load %arg1[%c0, %c0_0] : memref<8x7xf32, #tpu.memory_space<vmem>>, vector<8x7xf32>
    %1 = arith.truncf %0 : vector<8x7xf32> to vector<8x7xbf16>
    %c0_1 = arith.constant 0 : index
    %c0_2 = arith.constant 0 : index
    %2 = vector.load %arg2[%c0_1, %c0_2] : memref<7x49xbf16, #tpu.memory_space<vmem>>, vector<7x49xbf16>
    %cst = arith.constant dense<0.000000e+00> : vector<8x49xf32>
    %3 = tpu.matmul %1, %2, %cst {dimension_numbers = #tpu.dot_dimension_numbers<[1], [0], [0], [1], [0, 0, 1, 1], [], []>} : vector<8x7xbf16>, vector<7x49xbf16>, vector<8x49xf32> -> vector<8x49xf32>
    %c0_3 = arith.constant 0 : index
    %c0_4 = arith.constant 0 : index
    %4 = vector.load %arg3[%c0_3, %c0_4] : memref<1x49xf32, #tpu.memory_space<vmem>>, vector<1x49xf32>
    %5 = vector.broadcast %4 : vector<1x49xf32> to vector<8x49xf32>
    %6 = arith.addf %3, %5 : vector<8x49xf32>
    %cst_5 = arith.constant 0.000000e+00 : f32
    %7 = vector.broadcast %cst_5 : f32 to vector<8x49xf32>
    %8 = arith.maximumf %6, %7 : vector<8x49xf32>
    %9 = arith.truncf %8 : vector<8x49xf32> to vector<8x49xbf16>
    %c0_6 = arith.constant 0 : index
    %c0_7 = arith.constant 0 : index
    %10 = vector.load %arg4[%c0_6, %c0_7] : memref<49x196xbf16, #tpu.memory_space<vmem>>, vector<49x196xbf16>
    %cst_8 = arith.constant dense<0.000000e+00> : vector<8x196xf32>
    %11 = tpu.matmul %9, %10, %cst_8 {dimension_numbers = #tpu.dot_dimension_numbers<[1], [0], [0], [1], [0, 0, 1, 1], [], []>} : vector<8x49xbf16>, vector<49x196xbf16>, vector<8x196xf32> -> vector<8x196xf32>
    %c0_9 = arith.constant 0 : index
    %c0_10 = arith.constant 0 : index
    %12 = vector.load %arg5[%c0_9, %c0_10] : memref<1x196xf32, #tpu.memory_space<vmem>>, vector<1x196xf32>
    %13 = vector.broadcast %12 : vector<1x196xf32> to vector<8x196xf32>
    %14 = arith.addf %11, %13 : vector<8x196xf32>
    %cst_11 = arith.constant 0.000000e+00 : f32
    %15 = vector.broadcast %cst_11 : f32 to vector<8x196xf32>
    %16 = arith.maximumf %14, %15 : vector<8x196xf32>
    %17 = arith.truncf %16 : vector<8x196xf32> to vector<8x196xbf16>
    %c0_12 = arith.constant 0 : index
    %c0_13 = arith.constant 0 : index
    %18 = vector.load %arg6[%c0_12, %c0_13] : memref<196x784xbf16, #tpu.memory_space<vmem>>, vector<196x384xbf16>
    %cst_14 = arith.constant dense<0.000000e+00> : vector<8x384xf32>
    %19 = tpu.matmul %17, %18, %cst_14 {dimension_numbers = #tpu.dot_dimension_numbers<[1], [0], [0], [1], [0, 0, 1, 1], [], []>} : vector<8x196xbf16>, vector<196x384xbf16>, vector<8x384xf32> -> vector<8x384xf32>
    %c0_15 = arith.constant 0 : index
    %c0_16 = arith.constant 0 : index
    %20 = vector.load %arg7[%c0_15, %c0_16] : memref<1x784xf32, #tpu.memory_space<vmem>>, vector<1x384xf32>
    %21 = vector.broadcast %20 : vector<1x384xf32> to vector<8x384xf32>
    %22 = arith.addf %19, %21 : vector<8x384xf32>
    %23 = math.tanh %22 : vector<8x384xf32>
    %c0_17 = arith.constant 0 : index
    %c0_18 = arith.constant 0 : index
    %24 = vector.load %arg8[%c0_17, %c0_18] : memref<8x784xf32, #tpu.memory_space<vmem>>, vector<8x384xf32>
    tpu.vector_store %arg8[%c0_17, %c0_18], %23 {strides = array<i32>} : memref<8x784xf32, #tpu.memory_space<vmem>>, vector<8x384xf32>,
    %c0_19 = arith.constant 0 : index
    %c384 = arith.constant 384 : index
    %25 = vector.load %arg6[%c0_19, %c384] : memref<196x784xbf16, #tpu.memory_space<vmem>>, vector<196x400xbf16>
    %cst_20 = arith.constant dense<0.000000e+00> : vector<8x400xf32>
    %26 = tpu.matmul %17, %25, %cst_20 {dimension_numbers = #tpu.dot_dimension_numbers<[1], [0], [0], [1], [0, 0, 1, 1], [], []>} : vector<8x196xbf16>, vector<196x400xbf16>, vector<8x400xf32> -> vector<8x400xf32>
    %c0_21 = arith.constant 0 : index
    %c384_22 = arith.constant 384 : index
    %27 = vector.load %arg7[%c0_21, %c384_22] : memref<1x784xf32, #tpu.memory_space<vmem>>, vector<1x400xf32>
    %28 = vector.broadcast %27 : vector<1x400xf32> to vector<8x400xf32>
    %29 = arith.addf %26, %28 : vector<8x400xf32>
    %30 = math.tanh %29 : vector<8x400xf32>
    %c0_23 = arith.constant 0 : index
    %c384_24 = arith.constant 384 : index
    %31 = vector.load %arg8[%c0_23, %c384_24] : memref<8x784xf32, #tpu.memory_space<vmem>>, vector<8x400xf32>
    tpu.vector_store %arg8[%c0_23, %c384_24], %30 {strides = array<i32>} : memref<8x784xf32, #tpu.memory_space<vmem>>, vector<8x400xf32>,
    return
  }
  func.func @transform_0(%arg0: i32) -> (i32, i32) {
    %c0_i32 = arith.constant 0 : i32
    %c0_i32_0 = arith.constant 0 : i32
    return %arg0, %c0_i32 : i32, i32
  }
  func.func @transform_1(%arg0: i32) -> (i32, i32) {
    %c0_i32 = arith.constant 0 : i32
    %c0_i32_0 = arith.constant 0 : i32
    %c0_i32_1 = arith.constant 0 : i32
    return %c0_i32, %c0_i32_0 : i32, i32
  }
  func.func @transform_2(%arg0: i32) -> (i32, i32) {
    %c0_i32 = arith.constant 0 : i32
    %c0_i32_0 = arith.constant 0 : i32
    %c0_i32_1 = arith.constant 0 : i32
    return %c0_i32, %c0_i32_0 : i32, i32
  }
  func.func @transform_3(%arg0: i32) -> (i32, i32) {
    %c0_i32 = arith.constant 0 : i32
    %c0_i32_0 = arith.constant 0 : i32
    %c0_i32_1 = arith.constant 0 : i32
    return %c0_i32, %c0_i32_0 : i32, i32
  }
  func.func @transform_4(%arg0: i32) -> (i32, i32) {
    %c0_i32 = arith.constant 0 : i32
    %c0_i32_0 = arith.constant 0 : i32
    %c0_i32_1 = arith.constant 0 : i32
    return %c0_i32, %c0_i32_0 : i32, i32
  }
  func.func @transform_5(%arg0: i32) -> (i32, i32) {
    %c0_i32 = arith.constant 0 : i32
    %c0_i32_0 = arith.constant 0 : i32
    %c0_i32_1 = arith.constant 0 : i32
    return %c0_i32, %c0_i32_0 : i32, i32
  }
  func.func @transform_6(%arg0: i32) -> (i32, i32) {
    %c0_i32 = arith.constant 0 : i32
    %c0_i32_0 = arith.constant 0 : i32
    %c0_i32_1 = arith.constant 0 : i32
    return %c0_i32, %c0_i32_0 : i32, i32
  }
  func.func @transform_7(%arg0: i32) -> (i32, i32) {
    %c0_i32 = arith.constant 0 : i32
    %c0_i32_0 = arith.constant 0 : i32
    return %arg0, %c0_i32 : i32, i32
  }
}

</mosaic_0001>

<bundles_post_ra>
// kernel: tpu_custom_call.1
= control target key start
LH: loop header
LB: loop body
LE: loop exit
PB: predicated region body
PF: predicated region fallthrough
CT: control target
= control target key end

     0   :  { %12 = vsyncpa [#allocation3], 0  ;;  %s1582_s0 = inlined_call_operand.hbm [shape: f32[8,7], index: 0, kind: input, shape index: {}]   ;;  %s1583_s1 = inlined_call_operand.hbm [shape: bf16[7,49], index: 1, kind: input, shape index: {}]   ;;  %s1584_s2 = inlined_call_operand.vmem [shape: f32[1,49], index: 2, kind: input, shape index: {}]   ;;  %s1585_s3 = inlined_call_operand.hbm [shape: bf16[49,196], index: 3, kind: input, shape index: {}]   ;;  %s1586_s4 = inlined_call_operand.vmem [shape: f32[1,196], index: 4, kind: input, shape index: {}]   ;;  %s1587_s5 = inlined_call_operand.hbm [shape: bf16[196,784], index: 5, kind: input, shape index: {}]   ;;  %s1588_s6 = inlined_call_operand.vmem [shape: f32[1,784], index: 6, kind: input, shape index: {}]   ;;  %s1589_s7 = inlined_call_operand.hbm [shape: f32[8,784], index: 7, kind: output, shape index: {}]  }
   0x1   :  { %13 = vsyncpa [#allocation6], 0 }
   0x2   :  { %14 = vsyncpa [#allocation9], 0 }
   0x3   :  { %15 = vsyncpa [#allocation4], 0  ;;  %s1454_s24 = smov [#allocation5]   ;;  %s1455_s26 = smov [#allocation2]  }
   0x4   :  { %s32_s25 = sshll.u32 %s1454_s24, 4  ;;  %s22_s27 = sshll.u32 %s1455_s26, 4  ;;  %s33_s25 = int_to_ptr.vmem [resolvable:$true] %s32_s25  ;;  %s23_s27 = int_to_ptr.vmem [resolvable:$true] %s22_s27 }
   0x5   :  { %s1354_s28 = scalar_lea.vmem %s33_s25, 64  ;;  %p1359_p1 = scmp.lt.s32.totalorder %s33_s25, %s33_s25 }
   0x6   :  { %p1355_p0 = scmp.ne.s32.totalorder %s33_s25, %s1354_s28  ;;  %p1360_p2 = scmp.lt.s32.totalorder %s1354_s28, %s1354_s28 }
   0x8   :  { %p1361_p3 = por %p1360_p2, %p1359_p1 }
   0xa   :  { %p1362_p4 = pnand %p1361_p3, %p1355_p0 }
   0xc   :  { %1365 = shalt.err (!%p1362_p4)
}
   0xd   :  { %35 = dma.hbm_to_vmem [thread:$0]  %s1583_s1, 64, %s33_s25, [#allocation6]  }
   0xe   :  { %s1374_s8 = scalar_lea.vmem %s23_s27, 128  ;;  %p1379_p6 = scmp.lt.s32.totalorder %s23_s27, %s23_s27 }
   0xf   :  { %p1375_p5 = scmp.ne.s32.totalorder %s23_s27, %s1374_s8  ;;  %p1380_p7 = scmp.lt.s32.totalorder %s1374_s8, %s1374_s8 }
  0x11   :  { %p1381_p8 = por %p1380_p7, %p1379_p6 }
  0x13   :  { %p1382_p9 = pnand %p1381_p8, %p1375_p5 }
  0x15   :  { %1385 = shalt.err (!%p1382_p9)
}
  0x16   :  { %25 = dma.hbm_to_vmem [thread:$0]  %s1582_s0, 128, %s23_s27, [#allocation3]  }
  0x17   :  { %s1456_s11 = smov [#allocation7]  }
  0x18   :  { %s43_s12 = sshll.u32 %s1456_s11, 4  ;;  %s44_s12 = int_to_ptr.vmem [resolvable:$true] %s43_s12 }
  0x19   :  { %s1394_s13 = scalar_lea.vmem %s44_s12, 896  ;;  %p1399_p11 = scmp.lt.s32.totalorder %s44_s12, %s44_s12 }
  0x1a   :  { %p1395_p10 = scmp.ne.s32.totalorder %s44_s12, %s1394_s13  ;;  %p1400_p12 = scmp.lt.s32.totalorder %s1394_s13, %s1394_s13 }
  0x1c   :  { %p1401_p13 = por %p1400_p12, %p1399_p11 }
  0x1e   :  { %p1402_p0 = pnand %p1401_p13, %p1395_p10 }
  0x20   :  { %1405 = shalt.err (!%p1402_p0)
}
  0x21   :  { %s1457_s1 = smov 128   ;;  %s1458_s14 = smov 8  }
  0x22   :  { %49 = dma.hbm_to_vmem [thread:$0]  %s1585_s3, 896, %s44_s12, [#allocation6], %s1457_s1, %s1457_s1, %s1458_s14  }
  0x23   :  { %s1459_s17 = smov [#allocation8]  }
  0x24   :  { %s57_s18 = sshll.u32 %s1459_s17, 4  ;;  %s58_s18 = int_to_ptr.vmem [resolvable:$true] %s57_s18 }
  0x25   :  { %s1414_s0 = scalar_lea.vmem %s58_s18, 11200  ;;  %p1419_p2 = scmp.lt.s32.totalorder %s58_s18, %s58_s18 }
  0x26   :  { %p1415_p1 = scmp.ne.s32.totalorder %s58_s18, %s1414_s0  ;;  %p1420_p3 = scmp.lt.s32.totalorder %s1414_s0, %s1414_s0 }
  0x28   :  { %p1421_p4 = por %p1420_p3, %p1419_p2 }
  0x2a   :  { %p1422_p5 = pnand %p1421_p4, %p1415_p1 }
  0x2c   :  { %1425 = shalt.err (!%p1422_p5)
}
  0x2d   :  { %s1460_s19 = smov 448   ;;  %s1461_s20 = smov 28  }
  0x2e   :  { %63 = dma.hbm_to_vmem [thread:$0]  %s1587_s5, 11200, %s58_s18, [#allocation9], %s1460_s19, %s1460_s19, %s1461_s20  }
  0x2f   :  { %1446 = dma.done.wait [#allocation3], 128  }
  0x30   :  { %1447 = vsyncadd [#allocation3], 4294967168 }
  0x31   :  { %1448 = dma.done.wait [#allocation6], 960  }
  0x32   :  { %1449 = vsyncadd [#allocation6], 4294966336 }
  0x33   :  { %1450 = dma.done.wait [#allocation9], 11200  }
  0x34   :  { %1451 = vsyncadd [#allocation9], 4294956096  ;;  %vm93_vm0 = vcmask 1042432   ;;  %v1462_v0 = vmov 0.0   ;;  %vm94_vm1 = vcmask 1043456   ;;  %v1463_v1 = vmov 65535  }
  0x35   :  { %1175 = vmatprep.subr.bf16.mxu0 %v1462_v0  ;;  %v95_v2 = vsel %vm93_vm0, 4294967295, %v1463_v1  ;;  %vm1464_vm2 = vmmov 0   ;;  %v1465_v3 = vmov 0   ;;  %vm200_vm3 = vcmask 1040384   ;;  %v81_v5 = vld [vmem:[#allocation5] sm:$0xf] }
  0x36   :  { %1177 = vmatprep.mubr.msk.bf16.mxu0 %vm1464_vm2, %v1462_v0  ;;  %241 = vmatprep.mubr.bf16.mxu1 %v1465_v3  ;;  %v96_v4 = vsel %vm94_vm1, %v95_v2, 0  ;;  %v79_v6 = vld [vmem:[#allocation2] sm:$0xff]  ;;  %v202_v8 = vsel %vm200_vm3, 65535, %v1465_v3  ;;  %vm89_vm4 = vcmask 56320   ;;  %v1196_v15 = vld [vmem:[#allocation7 + $0x24] ss:$8 sps:$4 sm:$0xff]  }
  0x37   :  { %v148_v7 = vld [vmem:[#allocation7 + $0x30] sm:$0x11]  ;;  %v98_v9 = vand.u32 %v96_v4, %v81_v5  ;;  %v80_v12 = vpack.c.bf16 %v79_v6, %v79_v6  ;;  %v1198_v16 = vld [vmem:[#allocation7 + $0x20] ss:$8 sps:$4 sm:$0xff]   ;;  %v1202_v19 = vld [vmem:[#allocation7 + $0x4] ss:$8 sps:$4 sm:$0xff]  }
  0x38   :  { %v1073_v10 = vcombine.high %v148_v7, %v148_v7  ;;  %v1072_v11 = vcombine.low %v148_v7, %v148_v7  ;;  %v1199_v17 = vld [vmem:[#allocation7 + $0x14] ss:$8 sps:$4 sm:$0xff]   ;;  %v1201_v18 = vld [vmem:[#allocation7 + $0x10] ss:$8 sps:$4 sm:$0xff]   ;;  %v1204_v20 = vld [vmem:[#allocation7] ss:$8 sps:$4 sm:$0xff]  }
  0x39   :  { %1176 = vmatpush3.bf16.msra.mxu0 %v98_v9  ;;  %v1205_v21 = vld [vmem:[#allocation8 + $0x188] ss:$28 sps:$4 sm:$0xff]   ;;  %v1211_v23 = vld [vmem:[#allocation8 + $0x154] ss:$28 sps:$4 sm:$0xff]   ;;  %v1215_v25 = vld [vmem:[#allocation8 + $0x11c] ss:$28 sps:$4 sm:$0xff]  }
  0x3a   :  { %v207_v13 = vand.u32 %v1073_v10, %v202_v8  ;;  %v204_v14 = vand.u32 %v1072_v11, %v202_v8  ;;  %v1207_v22 = vld [vmem:[#allocation8 + $0x18c] ss:$28 sps:$4 sm:$0xff]   ;;  %v1213_v26 = vld [vmem:[#allocation8 + $0x118] ss:$28 sps:$4 sm:$0xff]   ;;  %v1219_v27 = vld [vmem:[#allocation8 + $0xe4] ss:$28 sps:$4 sm:$0xff]   ;;  %v151_v10 = vlaneseq }
  0x3b   :  { %535 = vmatprep.subr.bf16.mxu0 %v1207_v22  ;;  %v1209_v24 = vld [vmem:[#allocation8 + $0x150] ss:$28 sps:$4 sm:$0xff]   ;;  %v1217_v28 = vld [vmem:[#allocation8 + $0xe0] ss:$28 sps:$4 sm:$0xff]   ;;  %v1221_v30 = vld [vmem:[#allocation8 + $0xa8] ss:$28 sps:$4 sm:$0xff]  }
  0x3c   :  { %217 = vmatprep.subr.bf16.mxu1 %v207_v13  ;;  %1178 = vmatmul.mubr.msk.bf16.vlgmr.msra.gmra.mxu0 %vm89_vm4, %v80_v12  ;;  %v1223_v29 = vld [vmem:[#allocation8 + $0xac] ss:$28 sps:$4 sm:$0xff]   ;;  %v1227_v31 = vld [vmem:[#allocation8 + $0x74] ss:$28 sps:$4 sm:$0xff]   ;;  %v1231_v33 = vld [vmem:[#allocation8 + $0x3c] ss:$28 sps:$4 sm:$0xff]  }
  0x3d   :  { %218 = vmatpush1.bf16.msra.mxu1 %v204_v14  ;;  %536 = vmatpush1.bf16.msra.mxu0 %v1205_v21  ;;  %v1225_v32 = vld [vmem:[#allocation8 + $0x70] ss:$28 sps:$4 sm:$0xff]   ;;  %v1229_v34 = vld [vmem:[#allocation8 + $0x38] ss:$28 sps:$4 sm:$0xff]   ;;  %v1235_v35 = vld [vmem:[#allocation8 + $0x4] ss:$28 sps:$4 sm:$0xff]  }
  0x3e   :  { %219 = vmatprep.subr.bf16.mxu1 %v1196_v15  ;;  %537 = vmatprep.subr.bf16.mxu0 %v1211_v23  ;;  %v1233_v36 = vld [vmem:[#allocation8] ss:$28 sps:$4 sm:$0xff]   ;;  %vm525_vm5 = vcmask 1041408   ;;  %v1242_v41 = vld [vmem:[#allocation8 + $0x26c] ss:$28 sps:$4 sm:$0xff]   ;;  %vm196_vm6 = vcmask 400384  }
  0x3f   :  { %v302_v37 = vld [vmem:[#allocation8 + $0x2a0] sm:$0x33]  ;;  %v1246_v43 = vld [vmem:[#allocation8 + $0x234] ss:$28 sps:$4 sm:$0xff]   ;;  %v1064_v45 = vld [vmem:[%s1584_s2] ss:$0 sm:$0xff] }
  0x40   :  { %v1112_v38 = vcombine.high %v302_v37, %v302_v37  ;;  %v1111_v39 = vcombine.low %v302_v37, %v302_v37  ;;  %v1240_v42 = vld [vmem:[#allocation8 + $0x268] ss:$28 sps:$4 sm:$0xff]   ;;  %v1244_v44 = vld [vmem:[#allocation8 + $0x230] ss:$28 sps:$4 sm:$0xff]   ;;  %v1212_v54 = vld [vmem:[#allocation8 + $0x158] ss:$28 sps:$4 sm:$0xff]  }
  0x41   :  { %220 = vmatpush1.bf16.msra.mxu1 %v1198_v16  ;;  %538 = vmatpush1.bf16.msra.mxu0 %v1209_v24  ;;  %v1208_v51 = vld [vmem:[#allocation8 + $0x190] ss:$28 sps:$4 sm:$0xff]   ;;  %v1216_v55 = vld [vmem:[#allocation8 + $0x120] ss:$28 sps:$4 sm:$0xff]   ;;  %v1220_v56 = vld [vmem:[#allocation8 + $0xe8] ss:$28 sps:$4 sm:$0xff]  }
  0x42   :  { %221 = vmatprep.subr.bf16.mxu1 %v1199_v17  ;;  %539 = vmatprep.subr.bf16.mxu0 %v1215_v25  ;;  %v527_v40 = vsel %vm525_vm5, %v1111_v39, 0  ;;  %v1224_v57 = vld [vmem:[#allocation8 + $0xb0] ss:$28 sps:$4 sm:$0xff]   ;;  %v1228_v58 = vld [vmem:[#allocation8 + $0x78] ss:$28 sps:$4 sm:$0xff]   ;;  %v1540_v11 = vshrl.u32 %v151_v10, 7 }
  0x43   :  { %v1232_v59 = vld [vmem:[#allocation8 + $0x40] ss:$28 sps:$4 sm:$0xff]   ;;  %v1236_v60 = vld [vmem:[#allocation8 + $0x8] ss:$28 sps:$4 sm:$0xff]   ;;  %v1243_v63 = vld [vmem:[#allocation8 + $0x270] ss:$28 sps:$4 sm:$0xff]  }
  0x44   :  { %v1239_v61 = vld [vmem:[#allocation8 + $0x2a8] ss:$0 sps:$4 sm:$0x33]   ;;  %v1247_v0 = vld [vmem:[#allocation8 + $0x238] ss:$28 sps:$4 sm:$0xff]   ;;  %v1543_v12 = vsub.s32 0, %v1540_v11 }
  0x45   :  { %222 = vmatpush1.bf16.msra.mxu1 %v1201_v18  ;;  %540 = vmatpush1.bf16.msra.mxu0 %v1213_v26  ;;  %v533_v62 = vsel %vm525_vm5, %v1239_v61, 0  ;;  %v1250_v1 = vld [vmem:[#allocation8 + $0x1fc] ss:$28 sps:$4 sm:$0xff]   ;;  %v1254_v5 = vld [vmem:[#allocation8 + $0x1c4] ss:$28 sps:$4 sm:$0xff]   ;;  %vm521_vm7 = vcmask 556032  }
  0x46   :  { %223 = vmatprep.subr.bf16.mxu1 %v1202_v19  ;;  %541 = vmatprep.subr.bf16.mxu0 %v1219_v27  ;;  %v1248_v2 = vld [vmem:[#allocation8 + $0x1f8] ss:$28 sps:$4 sm:$0xff]   ;;  %v1251_v4 = vld [vmem:[#allocation8 + $0x200] ss:$28 sps:$4 sm:$0xff]   ;;  %v1255_v7 = vld [vmem:[#allocation8 + $0x1c8] ss:$28 sps:$4 sm:$0xff]  }
  0x47   :  { %v1252_v6 = vld [vmem:[#allocation8 + $0x1c0] ss:$28 sps:$4 sm:$0xff]   ;;  %v1258_v8 = vld [vmem:[#allocation8 + $0x198] ss:$28 sps:$4 sm:$0xff]   ;;  %v1325_v10 = vld [vmem:[#allocation8 + $0x210] ss:$28 sps:$4 sm:$0xff]  }
  0x48   :  { %v1261_v9 = vld [vmem:[#allocation8 + $0x1a0] ss:$28 sps:$4 sm:$0xff]   ;;  %v1256_v25 = vld [vmem:[#allocation8 + $0x194] ss:$28 sps:$4 sm:$0xff]   ;;  %vm1045_vm8 = vcmask 130048  }
  0x49   :  { %224 = vmatpush1.bf16.msra.mxu1 %v1204_v20  ;;  %542 = vmatpush1.bf16.msra.mxu0 %v1217_v28  ;;  %v149_v13 = vld [vmem:[%s1586_s4] sm:$0x3]  ;;  %v1279_v37 = vld [vmem:[#allocation8 + $0xf8] ss:$28 sps:$4 sm:$0xff]  }
  0x4a   :  { %576 = vmatprep.subr.bf16.mxu1 %v1465_v3  ;;  %543 = vmatprep.subr.bf16.mxu0 %v1223_v29  ;;  %v154_v14 = vrot.slane %v149_v13, %v1543_v12  ;;  %v1259_v26 = vld [vmem:[#allocation8 + $0x19c] ss:$28 sps:$4 sm:$0xff]   ;;  %v1267_v29 = vld [vmem:[#allocation8 + $0x168] ss:$28 sps:$4 sm:$0xff]   ;;  %v1277_v39 = vld [vmem:[#allocation8 + $0xf4] ss:$28 sps:$4 sm:$0xff]  }
  0x4b   :  { %v1264_v28 = vld [vmem:[#allocation8 + $0x160] ss:$28 sps:$4 sm:$0xff]  }
  0x4d   :  { %544 = vmatpush1.bf16.msra.mxu0 %v1221_v30  ;;  %v1262_v30 = vld [vmem:[#allocation8 + $0x15c] ss:$28 sps:$4 sm:$0xff]  }
  0x4e   :  { %545 = vmatprep.subr.bf16.mxu0 %v1227_v31  ;;  %v1265_v31 = vld [vmem:[#allocation8 + $0x164] ss:$28 sps:$4 sm:$0xff]  }
  0x51   :  { %546 = vmatpush1.bf16.msra.mxu0 %v1225_v32  ;;  %v1270_v32 = vld [vmem:[#allocation8 + $0x128] ss:$28 sps:$4 sm:$0xff]  }
  0x52   :  { %547 = vmatprep.subr.bf16.mxu0 %v1231_v33  ;;  %v1273_v33 = vld [vmem:[#allocation8 + $0x130] ss:$28 sps:$4 sm:$0xff]  }
  0x55   :  { %548 = vmatpush1.bf16.msra.mxu0 %v1229_v34  ;;  %v1268_v34 = vld [vmem:[#allocation8 + $0x124] ss:$28 sps:$4 sm:$0xff]  }
  0x56   :  { %549 = vmatprep.subr.bf16.mxu0 %v1235_v35  ;;  %v1271_v35 = vld [vmem:[#allocation8 + $0x12c] ss:$28 sps:$4 sm:$0xff]  }
  0x59   :  { %550 = vmatpush1.bf16.msra.mxu0 %v1233_v36  ;;  %v1276_v36 = vld [vmem:[#allocation8 + $0xf0] ss:$28 sps:$4 sm:$0xff]  }
  0x5a   :  { %1114 = vmatprep.subr.msk.bf16.mxu0 %vm525_vm5, %v1112_v38  ;;  %v1274_v38 = vld [vmem:[#allocation8 + $0xec] ss:$28 sps:$4 sm:$0xff]  }
  0x5d   :  { %558 = vmatpush2.bf16.msra.mxu0 %v527_v40  ;;  %v1282_v40 = vld [vmem:[#allocation8 + $0xb8] ss:$28 sps:$4 sm:$0xff]  }
  0x5e   :  { %559 = vmatprep.subr.bf16.mxu0 %v1242_v41  ;;  %v1285_v41 = vld [vmem:[#allocation8 + $0xc0] ss:$28 sps:$4 sm:$0xff]  }
  0x61   :  { %560 = vmatpush2.bf16.msra.mxu0 %v1240_v42  ;;  %v1280_v42 = vld [vmem:[#allocation8 + $0xb4] ss:$28 sps:$4 sm:$0xff]  }
  0x62   :  { %561 = vmatprep.subr.bf16.mxu0 %v1246_v43  ;;  %v1283_v43 = vld [vmem:[#allocation8 + $0xbc] ss:$28 sps:$4 sm:$0xff]  }
  0x65   :  { %562 = vmatpush2.bf16.msra.mxu0 %v1244_v44  ;;  %v1288_v44 = vld [vmem:[#allocation8 + $0x80] ss:$28 sps:$4 sm:$0xff]  }
  0x66   :  { %563 = vmatprep.subr.bf16.mxu0 %v1250_v1  ;;  %v1313_v1 = vld [vmem:[#allocation8 + $0x280] ss:$28 sps:$4 sm:$0xff]  }
  0x69   :  { %564 = vmatpush2.bf16.msra.mxu0 %v1248_v2  ;;  %v1308_v2 = vld [vmem:[#allocation8 + $0x274] ss:$28 sps:$4 sm:$0xff]  }
  0x6a   :  { %565 = vmatprep.subr.bf16.mxu0 %v1254_v5  ;;  %v1316_v5 = vld [vmem:[#allocation8 + $0x240] ss:$28 sps:$4 sm:$0xff]  }
  0x6d   :  { %566 = vmatpush2.bf16.msra.mxu0 %v1252_v6  ;;  %v1319_v6 = vld [vmem:[#allocation8 + $0x248] ss:$28 sps:$4 sm:$0xff]  }
  0x6e   :  { %956 = vmatprep.subr.bf16.mxu0 %v1258_v8  ;;  %v1317_v8 = vld [vmem:[#allocation8 + $0x244] ss:$28 sps:$4 sm:$0xff]  }
  0xfc   :  { %v134_v46 = vpop.f32.mrf.mxu0 }
  0xfd   :  { %v135_v47 = vadd.f32 %v1064_v45, %v134_v46  ;;  %v1291_v45 = vld [vmem:[#allocation8 + $0x88] ss:$28 sps:$4 sm:$0xff]   ;;  %v1286_v46 = vld [vmem:[#allocation8 + $0x7c] ss:$28 sps:$4 sm:$0xff]  }
  0xfe   :  { %v1179_v48 = vpop.f32.mrf.mxu0 }
  0xff   :  { %v140_v49 = vmax.f32 %v135_v47, 0.0  ;;  %v1289_v47 = vld [vmem:[#allocation8 + $0x84] ss:$28 sps:$4 sm:$0xff]  }
 0x100   :  { %v137_v50 = vpop.f32.mrf.mxu0  ;;  %v1294_v48 = vld [vmem:[#allocation8 + $0x48] ss:$28 sps:$4 sm:$0xff]  }
 0x101   :  { %v141_v52 = vpack.c.bf16 %v140_v49, %v140_v49  ;;  %v1297_v49 = vld [vmem:[#allocation8 + $0x50] ss:$28 sps:$4 sm:$0xff]   ;;  %v1292_v50 = vld [vmem:[#allocation8 + $0x44] ss:$28 sps:$4 sm:$0xff]  }
 0x102   :  { %v1180_v53 = vpop.f32.mrf.mxu0 }
 0x103   :  { %1074 = vmatmul.mubr.msk.bf16.vlgmr.msra.gmra.mxu1 %vm196_vm6, %v141_v52  ;;  %v1300_v52 = vld [vmem:[#allocation8 + $0x10] ss:$28 sps:$4 sm:$0xff]   ;;  %v1303_v53 = vld [vmem:[#allocation8 + $0x18] ss:$28 sps:$4 sm:$0xff]  }
 0x104   :  { %577 = vmatpush1.bf16.msra.mxu1 %v1208_v51  ;;  %v1295_v51 = vld [vmem:[#allocation8 + $0x4c] ss:$28 sps:$4 sm:$0xff]  }
 0x105   :  { %578 = vmatprep.subr.bf16.mxu1 %v1465_v3 }
 0x108   :  { %579 = vmatpush1.bf16.msra.mxu1 %v1212_v54  ;;  %v670_v54 = vld [vmem:[#allocation8 + $0x2ac] sm:$0x33] }
 0x109   :  { %580 = vmatprep.subr.bf16.mxu1 %v1465_v3 }
 0x10c   :  { %581 = vmatpush1.bf16.msra.mxu1 %v1216_v55  ;;  %v671_v55 = vld [vmem:[#allocation8 + $0x2b4] sm:$0x33] }
 0x10d   :  { %582 = vmatprep.subr.bf16.mxu1 %v1465_v3  ;;  %v1167_v61 = vcombine.low %v671_v55, %v671_v55 }
 0x110   :  { %583 = vmatpush1.bf16.msra.mxu1 %v1220_v56  ;;  %v1298_v56 = vld [vmem:[#allocation8 + $0xc] ss:$28 sps:$4 sm:$0xff]  }
 0x111   :  { %584 = vmatprep.subr.bf16.mxu1 %v1465_v3 }
 0x114   :  { %585 = vmatpush1.bf16.msra.mxu1 %v1224_v57  ;;  %v1301_v57 = vld [vmem:[#allocation8 + $0x14] ss:$28 sps:$4 sm:$0xff]  }
 0x115   :  { %586 = vmatprep.subr.bf16.mxu1 %v1465_v3 }
 0x118   :  { %587 = vmatpush1.bf16.msra.mxu1 %v1228_v58  ;;  %v1166_v58 = vcombine.high %v670_v54, %v670_v54 }
 0x119   :  { %588 = vmatprep.subr.bf16.mxu1 %v1465_v3 }
 0x11c   :  { %589 = vmatpush1.bf16.msra.mxu1 %v1232_v59  ;;  %v1168_v59 = vcombine.high %v671_v55, %v671_v55 }
 0x11d   :  { %590 = vmatprep.subr.bf16.mxu1 %v1465_v3 }
 0x120   :  { %591 = vmatpush1.bf16.msra.mxu1 %v1236_v60  ;;  %v1165_v60 = vcombine.low %v670_v54, %v670_v54 }
 0x121   :  { %598 = vmatprep.subr.bf16.mxu1 %v1465_v3 }
 0x124   :  { %599 = vmatpush2.bf16.msra.mxu1 %v533_v62  ;;  %v945_v62 = vsel %vm525_vm5, %v1165_v60, 0 }
 0x125   :  { %600 = vmatprep.subr.bf16.mxu1 %v1465_v3 }
 0x128   :  { %601 = vmatpush2.bf16.msra.mxu1 %v1243_v63  ;;  %v951_v63 = vsel %vm525_vm5, %v1167_v61, 0 }
 0x129   :  { %602 = vmatprep.subr.bf16.mxu1 %v1465_v3 }
 0x12c   :  { %603 = vmatpush2.bf16.msra.mxu1 %v1247_v0  ;;  %v1310_v0 = vld [vmem:[#allocation8 + $0x278] ss:$28 sps:$4 sm:$0xff]  }
 0x12d   :  { %604 = vmatprep.subr.bf16.mxu1 %v1465_v3 }
 0x130   :  { %605 = vmatpush2.bf16.msra.mxu1 %v1251_v4  ;;  %v1311_v4 = vld [vmem:[#allocation8 + $0x27c] ss:$28 sps:$4 sm:$0xff]  }
 0x131   :  { %606 = vmatprep.subr.bf16.mxu1 %v1465_v3  ;;  %v1549_v3 = vsub.s32 1, %v1540_v11 }
 0x133   :  { %v158_v15 = vrot.slane %v149_v13, %v1549_v3  ;;  %v1320_v13 = vld [vmem:[#allocation8 + $0x204] ss:$28 sps:$4 sm:$0xff]  }
 0x134   :  { %607 = vmatpush2.bf16.msra.mxu1 %v1255_v7  ;;  %v1314_v7 = vld [vmem:[#allocation8 + $0x23c] ss:$28 sps:$4 sm:$0xff]  }
 0x135   :  { %997 = vmatprep.subr.bf16.mxu1 %v1261_v9  ;;  %v1322_v9 = vld [vmem:[#allocation8 + $0x208] ss:$28 sps:$4 sm:$0xff]  }
 0x1c3   :  { %v243_v16 = vpop.f32.mrf.mxu1 }
 0x1c4   :  { %v244_v17 = vadd.f32 %v243_v16, %v154_v14  ;;  %v1323_v14 = vld [vmem:[#allocation8 + $0x20c] ss:$28 sps:$4 sm:$0xff]   ;;  %v1331_v16 = vld [vmem:[#allocation8 + $0x1d8] ss:$28 sps:$4 sm:$0xff]  }
 0x1c5   :  { %v245_v18 = vpop.f32.mrf.mxu1 }
 0x1c6   :  { %v246_v19 = vadd.f32 %v245_v18, %v158_v15  ;;  %v250_v20 = vmax.f32 %v244_v17, 0.0  ;;  %v1328_v15 = vld [vmem:[#allocation8 + $0x1d0] ss:$28 sps:$4 sm:$0xff]  }
 0x1c7   :  { %v247_v21 = vpop.f32.mrf.mxu1  ;;  %v1326_v17 = vld [vmem:[#allocation8 + $0x1cc] ss:$28 sps:$4 sm:$0xff]   ;;  %v1329_v18 = vld [vmem:[#allocation8 + $0x1d4] ss:$28 sps:$4 sm:$0xff]  }
 0x1c8   :  { %v251_v22 = vmax.f32 %v246_v19, 0.0  ;;  %v1553_v27 = vpack.c.bf16 %v250_v20, %v250_v20  ;;  %v316_v19 = vsub.s32 2, %v1540_v11  ;;  %v304_v20 = vld [vmem:[%s1588_s6] sm:$0x7] }
 0x1c9   :  { %v248_v23 = vpop.f32.mrf.mxu1  ;;  %v309_v21 = vrot.slane %v304_v20, %v1543_v12 }
 0x1ca   :  { %v253_v24 = vpack.c.bf16 %v251_v22, %v251_v22  ;;  %v317_v22 = vrot.slane %v304_v20, %v316_v19  ;;  %v313_v23 = vrot.slane %v304_v20, %v1549_v3 }
 0x1cc   :  { %1115 = vmatprep.mubr.msk.bf16.mxu0 %vm521_vm7, %v253_v24  ;;  %1116 = vmatprep.mubr.msk.bf16.mxu1 %vm521_vm7, %v253_v24 }
 0x1cd   :  { %568 = vmatmul.mubr.bf16.vlgmr.msra.gmra.mxu0 %v1553_v27  ;;  %609 = vmatmul.mubr.bf16.vlgmr.msra.gmra.mxu1 %v1553_v27 }
 0x1ce   :  { %957 = vmatpush1.bf16.msra.mxu0 %v1256_v25  ;;  %998 = vmatpush1.bf16.msra.mxu1 %v1259_v26 }
 0x1cf   :  { %1170 = vmatprep.mubr.msk.bf16.mxu0 %vm521_vm7, %v253_v24  ;;  %1172 = vmatprep.mubr.msk.bf16.mxu1 %vm521_vm7, %v253_v24 }
 0x1d0   :  { %958 = vmatprep.subr.bf16.mxu0 %v1264_v28  ;;  %999 = vmatprep.subr.bf16.mxu1 %v1267_v29 }
 0x1d2   :  { %959 = vmatpush1.bf16.msra.mxu0 %v1262_v30  ;;  %1000 = vmatpush1.bf16.msra.mxu1 %v1265_v31 }
 0x1d3   :  { %960 = vmatprep.subr.bf16.mxu0 %v1270_v32  ;;  %1001 = vmatprep.subr.bf16.mxu1 %v1273_v33 }
 0x1d6   :  { %961 = vmatpush1.bf16.msra.mxu0 %v1268_v34  ;;  %1002 = vmatpush1.bf16.msra.mxu1 %v1271_v35 }
 0x1d7   :  { %962 = vmatprep.subr.bf16.mxu0 %v1276_v36  ;;  %1003 = vmatprep.subr.bf16.mxu1 %v1279_v37 }
 0x1da   :  { %963 = vmatpush1.bf16.msra.mxu0 %v1274_v38  ;;  %1004 = vmatpush1.bf16.msra.mxu1 %v1277_v39  ;;  %v672_v38 = vld [vmem:[%s1588_s6 + $0x3] sm:$0xf]  ;;  %v688_v39 = vsub.s32 3, %v1540_v11  ;;  %s1466_s6 = smov [#allocation10]  }
 0x1db   :  { %964 = vmatprep.subr.bf16.mxu0 %v1282_v40  ;;  %1005 = vmatprep.subr.bf16.mxu1 %v1285_v41  ;;  %v677_v40 = vrot.slane %v672_v38, %v1543_v12  ;;  %v685_v41 = vrot.slane %v672_v38, %v316_v19  ;;  %s1053_s27 = sshll.u32 %s1466_s6, 4  ;;  %s1054_s27 = int_to_ptr.vmem [resolvable:$true] %s1053_s27 }
 0x1dc   :  { %s1426_s28 = scalar_lea.vmem %s1054_s27, 896  ;;  %p1431_p7 = scmp.lt.s32.totalorder %s1054_s27, %s1054_s27 }
 0x1dd   :  { %p1427_p6 = scmp.ne.s32.totalorder %s1054_s27, %s1426_s28  ;;  %p1432_p8 = scmp.lt.s32.totalorder %s1426_s28, %s1426_s28 }
 0x1de   :  { %965 = vmatpush1.bf16.msra.mxu0 %v1280_v42  ;;  %1006 = vmatpush1.bf16.msra.mxu1 %v1283_v43  ;;  %v681_v42 = vrot.slane %v672_v38, %v1549_v3  ;;  %v689_v43 = vrot.slane %v672_v38, %v688_v39 }
 0x1df   :  { %966 = vmatprep.subr.bf16.mxu0 %v1288_v44  ;;  %1007 = vmatprep.subr.bf16.mxu1 %v1291_v45  ;;  %p1433_p9 = por %p1432_p8, %p1431_p7 }
 0x1e1   :  { %p1434_p10 = pnand %p1433_p9, %p1427_p6 }
 0x1e2   :  { %967 = vmatpush1.bf16.msra.mxu0 %v1286_v46  ;;  %1008 = vmatpush1.bf16.msra.mxu1 %v1289_v47 }
 0x1e3   :  { %968 = vmatprep.subr.bf16.mxu0 %v1294_v48  ;;  %1009 = vmatprep.subr.bf16.mxu1 %v1297_v49 }
 0x1e6   :  { %969 = vmatpush1.bf16.msra.mxu0 %v1292_v50  ;;  %1010 = vmatpush1.bf16.msra.mxu1 %v1295_v51 }
 0x1e7   :  { %970 = vmatprep.subr.bf16.mxu0 %v1300_v52  ;;  %1011 = vmatprep.subr.bf16.mxu1 %v1303_v53 }
 0x1ea   :  { %971 = vmatpush1.bf16.msra.mxu0 %v1298_v56  ;;  %1012 = vmatpush1.bf16.msra.mxu1 %v1301_v57 }
 0x1eb   :  { %1169 = vmatprep.subr.msk.bf16.mxu0 %vm525_vm5, %v1166_v58  ;;  %1171 = vmatprep.subr.msk.bf16.mxu1 %vm525_vm5, %v1168_v59 }
 0x1ee   :  { %979 = vmatpush2.bf16.msra.mxu0 %v945_v62  ;;  %1020 = vmatpush2.bf16.msra.mxu1 %v951_v63 }
 0x1ef   :  { %980 = vmatprep.subr.bf16.mxu0 %v1310_v0  ;;  %1021 = vmatprep.subr.bf16.mxu1 %v1313_v1 }
 0x1f2   :  { %981 = vmatpush2.bf16.msra.mxu0 %v1308_v2  ;;  %1022 = vmatpush2.bf16.msra.mxu1 %v1311_v4 }
 0x1f3   :  { %982 = vmatprep.subr.bf16.mxu0 %v1316_v5  ;;  %1023 = vmatprep.subr.bf16.mxu1 %v1319_v6 }
 0x1f6   :  { %983 = vmatpush2.bf16.msra.mxu0 %v1314_v7  ;;  %1024 = vmatpush2.bf16.msra.mxu1 %v1317_v8 }
 0x1f7   :  { %984 = vmatprep.subr.bf16.mxu0 %v1322_v9  ;;  %1025 = vmatprep.subr.bf16.mxu1 %v1325_v10 }
 0x1fa   :  { %985 = vmatpush2.bf16.msra.mxu0 %v1320_v13  ;;  %1026 = vmatpush2.bf16.msra.mxu1 %v1323_v14 }
 0x1fb   :  { %986 = vmatprep.subr.bf16.mxu0 %v1328_v15  ;;  %1027 = vmatprep.subr.bf16.mxu1 %v1331_v16 }
 0x1fe   :  { %987 = vmatpush2.bf16.msra.mxu0 %v1326_v17  ;;  %1028 = vmatpush2.bf16.msra.mxu1 %v1329_v18 }
 0x201   :  { %989 = vmatmul.mubr.bf16.vlgmr.msra.gmra.mxu0 %v1553_v27  ;;  %1030 = vmatmul.mubr.bf16.vlgmr.msra.gmra.mxu1 %v1553_v27 }
 0x28d   :  { %v569_v24 = vpop.f32.mrf.mxu0  ;;  %v610_v25 = vpop.f32.mrf.mxu1 }
 0x28e   :  { %v570_v26 = vadd.f32 %v569_v24, %v309_v21  ;;  %v611_v28 = vadd.f32 %v610_v25, %v317_v22 }
 0x28f   :  { %v571_v29 = vpop.f32.mrf.mxu0  ;;  %v612_v30 = vpop.f32.mrf.mxu1 }
 0x290   :  { %1332 = vtanh.f32 %v570_v26  ;;  %v572_v31 = vadd.f32 %v571_v29, %v313_v23 }
 0x291   :  { %1334 = vtanh.f32 %v611_v28  ;;  %v573_v27 = vpop.f32.mrf.mxu0  ;;  %v613_v32 = vpop.f32.mrf.mxu1 }
 0x292   :  { %1336 = vtanh.f32 %v572_v31 }
 0x293   :  { %v574_v33 = vpop.f32.mrf.mxu0  ;;  %v614_v34 = vpop.f32.mrf.mxu1 }
 0x29d   :  { %v1333_v35 = vpop.eup %1332 }
 0x29e   :  { %v1335_v36 = vpop.eup %1334  ;;  %619 = vst [vmem:[#allocation10] sm:$0xff] %v1333_v35 }
 0x29f   :  { %v1337_v37 = vpop.eup %1336  ;;  %621 = vst [vmem:[#allocation10 + $0x10] sm:$0xff] %v1335_v36 }
 0x2a0   :  { %620 = vst [vmem:[#allocation10 + $0x8] sm:$0xff] %v1337_v37 }
 0x2c1   :  { %v990_v44 = vpop.f32.mrf.mxu0  ;;  %v1031_v45 = vpop.f32.mrf.mxu1 }
 0x2c2   :  { %v991_v46 = vadd.f32 %v990_v44, %v677_v40  ;;  %v1032_v47 = vadd.f32 %v1031_v45, %v685_v41 }
 0x2c3   :  { %v992_v48 = vpop.f32.mrf.mxu0  ;;  %v1033_v49 = vpop.f32.mrf.mxu1 }
 0x2c4   :  { %1338 = vtanh.f32 %v991_v46  ;;  %v993_v50 = vadd.f32 %v992_v48, %v681_v42  ;;  %v1034_v51 = vadd.f32 %v1033_v49, %v689_v43 }
 0x2c5   :  { %1340 = vtanh.f32 %v1032_v47  ;;  %v994_v52 = vpop.f32.mrf.mxu0  ;;  %v1035_v53 = vpop.f32.mrf.mxu1 }
 0x2c6   :  { %1342 = vtanh.f32 %v993_v50 }
 0x2c7   :  { %1344 = vtanh.f32 %v1034_v51  ;;  %v995_v11 = vpop.f32.mrf.mxu0  ;;  %v1036_v12 = vpop.f32.mrf.mxu1 }
 0x2d1   :  { %v1339_v3 = vpop.eup %1338 }
 0x2d2   :  { %v1341_v54 = vpop.eup %1340  ;;  %1042 = vst [vmem:[#allocation10 + $0x18] sm:$0xff] %v1339_v3 }
 0x2d3   :  { %v1343_v55 = vpop.eup %1342  ;;  %1044 = vst [vmem:[#allocation10 + $0x28] sm:$0xff] %v1341_v54 }
 0x2d4   :  { %v1345_v56 = vpop.eup %1344  ;;  %1043 = vst [vmem:[#allocation10 + $0x20] sm:$0xff] %v1343_v55 }
 0x2d5   :  { %1046 = vst.msk [vmem:[#allocation10 + $0x30] sm:$0xff] %vm1045_vm8, %v1345_v56 }
 0x2d6   :  { %1437 = shalt.err (!%p1434_p10)
}
 0x2d7   :  { %1056 = dma.vmem_to_hbm [thread:$0]  %s1054_s27, 896, %s1589_s7, [#allocation4]  }
 0x2d8   :  { %1452 = dma.done.wait [#allocation4], 896  }
 0x2d9   :  { %1453 = vsyncadd [#allocation4], 4294966400 }
 0x2da   :  { %1060 = vsyncpa [#allocation3], 1 }
 0x2db   :  { %1061 = vsyncpa [#allocation6], 1 }
 0x2dc   :  { %1062 = vsyncpa [#allocation9], 1 }
 0x2dd   :  { %1063 = vsyncpa [#allocation4], 1 }

</bundles_post_ra>
